<compile_context>
chip_gen: v5e
topology: v5e:2x2
jax: 0.10.0
libtpu: 0.0.40
codegen_flags: <defaults>
</compile_context>

<pallas_src>
import math
import functools

import numpy as np
import jax
import jax.numpy as jnp
from jax.experimental import pallas as pl
from jax.experimental.pallas import tpu as pltpu


# ---------------------------------------------------------------------------
# Per-chip VMEM budgets
# ---------------------------------------------------------------------------
def _vmem_budget():
    """Return (block-sizing budget, vmem_limit_bytes) from the chip's VMEM."""
    phys = 64 * 1024 * 1024                      # conservative fallback (v7x per-TC)
    try:
        info = pltpu.get_tpu_info()
        for name in ("vmem_capacity_bytes", "vmem_bytes", "vmem_size_bytes"):
            cap = getattr(info, name, None)
            if cap:
                phys = int(cap)
                break
    except Exception:
        pass
    phys = max(32 * 1024 * 1024, min(phys, 128 * 1024 * 1024))
    return (phys * 3) // 8, (phys * 3) // 4


# ---------------------------------------------------------------------------
# Kernel 1: fused 1x1 conv (BN folded) -> ReLU -> (Dropout eval = id) -> 1x1 conv
# Channel-sublane / pixel-lane: consumes a (C2, TP) bf16 tile, emits a
# lane-dense (Cout, TP) bf16 tile. Partial trailing pixel blocks are masked.
# ---------------------------------------------------------------------------
def fuse_conv_kernel(x_ref, w1_ref, b1_ref, w2_ref, b2_ref, o_ref):
    x = x_ref[0]                                                        # (C2, TP) bf16
    h = jnp.dot(w1_ref[...], x, preferred_element_type=jnp.float32)     # (Cin, TP) f32
    h = jnp.maximum(h + b1_ref[...], 0.0)                               # folded BN bias + ReLU
    # TODO(synk): Dropout(0.1) is identity in inference; training-mode RNG dropout not implemented.
    y = jnp.dot(w2_ref[...], h.astype(w2_ref.dtype),
                preferred_element_type=jnp.float32) + b2_ref[...]       # (Cout, TP) f32
    o_ref[0] = y.astype(o_ref.dtype)                                    # lane-dense bf16 store


# ---------------------------------------------------------------------------
# Kernel 2: bilinear upsample (align_corners=True).
# y block is (CB*H, W): width upsample is a single merged-M MXU matmul,
# height upsample is a statically unrolled per-channel matmul whose (sH, sW)
# result is stored directly into an aligned slice of the (CB*sH, sW) output.
# ---------------------------------------------------------------------------
def upsample_kernel(axT_ref, ay_ref, y_ref, o_ref, *, cb, h, sh):
    yb = y_ref[0]                                                       # (CB*H, W)  bf16
    t = jnp.dot(yb, axT_ref[...], preferred_element_type=jnp.float32)   # (CB*H, sW) f32
    ay = ay_ref[...]                                                    # (sH, H)    f32
    for c in range(cb):                       # static unroll, aligned slices
        tc = t[c * h:(c + 1) * h, :]                                    # (H, sW)
        oc = jnp.dot(ay, tc, preferred_element_type=jnp.float32)        # (sH, sW)
        o_ref[0, c * sh:(c + 1) * sh, :] = oc.astype(o_ref.dtype)


def bilinear_matrix(in_size, out_size):
    """Interpolation matrix A (out_size, in_size) for align_corners=True bilinear."""
    A = np.zeros((out_size, in_size), dtype=np.float32)
    if in_size == 1 or out_size == 1:
        A[:, 0] = 1.0
        return A
    scale = (in_size - 1) / (out_size - 1)
    for o in range(out_size):
        src = o * scale
        i0 = min(int(np.floor(src)), in_size - 1)
        i1 = min(i0 + 1, in_size - 1)
        w1 = src - i0
        A[o, i0] += 1.0 - w1
        A[o, i1] += w1
    return A


# ---------------------------------------------------------------------------
# Tiling helpers
# ---------------------------------------------------------------------------
def _pixel_tile(hw, c2, cout, budget_bytes, n_batch):
    """Pixel tile: multiple of 512 (MXU/lane friendly) with double-buffered
    bf16 in+out blocks within the VMEM budget; keeps >=2 total grid steps."""
    per_px = 2 * 2 * (c2 + cout)                 # 2 buffers * bf16 * (C2 + Cout)
    cap = max(512, (budget_bytes // per_px) // 512 * 512)
    tp = hw if hw <= cap else cap
    if n_batch * pl.cdiv(hw, tp) < 2:            # feed both v7x TensorCores
        gran = 512 if hw >= 1024 else 128
        half = pl.cdiv(pl.cdiv(hw, 2), gran) * gran
        if gran <= half < hw:
            tp = half
    return tp


def _block_base(h, sh):
    """Channel granularity so CB*H (bf16 in) and CB*sH (f32 out) blocks are
    sublane-aligned."""
    g1 = 16 // math.gcd(h, 16)
    g2 = 8 // math.gcd(sh, 8)
    return g1 * g2 // math.gcd(g1, g2)


def _channel_block(cout, h, w, scale, budget_bytes, n_batch):
    """Channels per upsample step; accounts for in/out double buffers, the
    in-kernel f32 temporaries and the interpolation matrices."""
    hw = h * w
    sh, sw = scale * h, scale * w
    fixed = 2 * (sh * h * 4 + w * sw * 2)        # Ay (f32) + AxT (bf16), double-buffered
    per_c = 2 * (2 * hw)                         # y block, bf16, double-buffered
    per_c += 2 * (4 * sh * sw)                   # out block, f32, double-buffered
    per_c += 4 * h * sw + 4 * sh * sw            # in-kernel temps: t row-chunk + one oc
    cap = max(1, (budget_bytes - fixed) // per_c)
    base = _block_base(h, sh)
    if cap >= cout:
        cb = cout
    else:
        cb = min(cout, max(base, cap // base * base))
    if n_batch * pl.cdiv(cout, cb) < 2:          # feed both v7x TensorCores
        half = pl.cdiv(pl.cdiv(cout, 2), base) * base
        if base <= half < cb:
            cb = half
    return cb


# ---------------------------------------------------------------------------
# Forward
# ---------------------------------------------------------------------------
def fuse2d_forward(x, w1, gamma, beta, rmean, rvar, w2, b2, eps=1e-5, scale=2):
    N, C2, H, W = x.shape
    Cin = w1.shape[0]
    Cout = w2.shape[0]
    HW = H * W
    sH, sW = scale * H, scale * W

    block_budget, vmem_limit = _vmem_budget()

    # Fold BatchNorm (eval) into the first conv in f32, then cast weights to bf16.
    s = gamma / jnp.sqrt(rvar + eps)
    w1f = (w1 * s[:, None]).astype(jnp.bfloat16)          # (Cin, C2)
    b1 = (beta - rmean * s).reshape(Cin, 1)                # (Cin, 1)  f32
    w2b = w2.astype(jnp.bfloat16)                          # (Cout, Cin)
    b2c = b2.reshape(Cout, 1)                              # (Cout, 1) f32

    # bf16 channel-sublane / pixel-lane slabs (NCHW native, free trailing merge).
    xb = x.astype(jnp.bfloat16).reshape(N, C2, HW)

    # ---- stage 1: pointwise convs ----
    TP = _pixel_tile(HW, C2, Cout, block_budget, N)
    n_tiles = pl.cdiv(HW, TP)
    cost1 = pl.CostEstimate(
        flops=2 * N * HW * Cin * (C2 + Cout),
        transcendentals=0,
        bytes_accessed=2 * N * HW * (C2 + Cout) + 2 * Cin * (C2 + Cout) + 4 * (Cin + Cout))

    y = pl.pallas_call(
        fuse_conv_kernel,
        out_shape=jax.ShapeDtypeStruct((N, Cout, HW), jnp.bfloat16),
        grid=(N, n_tiles),
        in_specs=[
            pl.BlockSpec((1, C2, TP), lambda n, p: (n, 0, p)),
            pl.BlockSpec((Cin, C2), lambda n, p: (0, 0)),
            pl.BlockSpec((Cin, 1), lambda n, p: (0, 0)),
            pl.BlockSpec((Cout, Cin), lambda n, p: (0, 0)),
            pl.BlockSpec((Cout, 1), lambda n, p: (0, 0)),
        ],
        out_specs=pl.BlockSpec((1, Cout, TP), lambda n, p: (n, 0, p)),
        compiler_params=pltpu.CompilerParams(
            dimension_semantics=("parallel", "parallel"),
            vmem_limit_bytes=vmem_limit),
        cost_estimate=cost1,
    )(xb, w1f, b1, w2b, b2c)

    # ---- stage 2: bilinear upsample (align_corners=True) ----
    # (N, Cout, HW) -> (N, Cout*H, W) is a free row-major reshape: the bf16
    # intermediate is written and read exactly once, with no relayout.
    y4 = y.reshape(N, Cout * H, W)
    Ay = jnp.asarray(bilinear_matrix(H, sH))                            # (sH, H)  f32
    AxT = jnp.asarray(bilinear_matrix(W, sW)).T.astype(jnp.bfloat16)    # (W, sW)  bf16
    CB = _channel_block(Cout, H, W, scale, block_budget, N)
    n_cblk = pl.cdiv(Cout, CB)
    cost2 = pl.CostEstimate(
        flops=2 * N * Cout * H * sW * (W + sH),
        transcendentals=0,
        bytes_accessed=2 * N * Cout * HW + 4 * N * Cout * sH * sW + 4 * sH * H + 2 * W * sW)

    out = pl.pallas_call(
        functools.partial(upsample_kernel, cb=CB, h=H, sh=sH),
        out_shape=jax.ShapeDtypeStruct((N, Cout * sH, sW), jnp.float32),
        grid=(N, n_cblk),
        in_specs=[
            pl.BlockSpec((W, sW), lambda n, c: (0, 0)),
            pl.BlockSpec((sH, H), lambda n, c: (0, 0)),
            pl.BlockSpec((1, CB * H, W), lambda n, c: (n, c, 0)),
        ],
        out_specs=pl.BlockSpec((1, CB * sH, sW), lambda n, c: (n, c, 0)),
        compiler_params=pltpu.CompilerParams(
            dimension_semantics=("parallel", "parallel"),
            vmem_limit_bytes=vmem_limit),
        cost_estimate=cost2,
    )(AxT, Ay, y4)

    return out.reshape(N, Cout, sH, sW)          # free split of the merged dim


def fuse2d_reference(x, w1, gamma, beta, rmean, rvar, w2, b2, eps=1e-5, scale=2):
    """Pure-JAX f32 reference with identical (eval-mode) semantics."""
    s = gamma / jnp.sqrt(rvar + eps)
    bias = beta - rmean * s
    h = jnp.einsum('oc,nchw->nohw', w1, x)
    h = h * s[None, :, None, None] + bias[None, :, None, None]
    h = jnp.maximum(h, 0.0)
    y = jnp.einsum('oc,nchw->nohw', w2, h) + b2[None, :, None, None]
    H, W = x.shape[2], x.shape[3]
    Ay = jnp.asarray(bilinear_matrix(H, scale * H))
    Ax = jnp.asarray(bilinear_matrix(W, scale * W))
    up = jnp.einsum('Oh,nchw->ncOw', Ay, y)
    up = jnp.einsum('Ow,nchw->nchO', Ax, up)
    return up


if __name__ == "__main__":
    N, Cin, Cout, H, W = 2, 4, 8, 16, 16

    key = jax.random.PRNGKey(0)
    ks = jax.random.split(key, 8)
    x = jax.random.normal(ks[0], (N, 2 * Cin, H, W), jnp.float32)
    # Conv2d(2*Cin, Cin, 1, bias=False) weight, squeezed (out, in, 1, 1) -> (out, in)
    w1 = 0.1 * jax.random.normal(ks[1], (Cin, 2 * Cin), jnp.float32)
    # BatchNorm2d(Cin) parameters + running stats (eval mode)
    gamma = 1.0 + 0.1 * jax.random.normal(ks[2], (Cin,), jnp.float32)
    beta = 0.1 * jax.random.normal(ks[3], (Cin,), jnp.float32)
    rmean = 0.1 * jax.random.normal(ks[4], (Cin,), jnp.float32)
    rvar = jax.random.uniform(ks[5], (Cin,), jnp.float32, 0.5, 1.5)
    # Conv2d(Cin, Cout, 1, bias=True)
    w2 = 0.1 * jax.random.normal(ks[6], (Cout, Cin), jnp.float32)
    b2 = 0.1 * jax.random.normal(ks[7], (Cout,), jnp.float32)

    # Fusion-head semantics of the previously validated kernel: 2x upsample.
    out2 = jax.block_until_ready(
        fuse2d_forward(x, w1, gamma, beta, rmean, rvar, w2, b2, scale=2))
    assert out2.shape == (N, Cout, 2 * H, 2 * W), out2.shape
    ref2 = fuse2d_reference(x, w1, gamma, beta, rmean, rvar, w2, b2, scale=2)
    np.testing.assert_allclose(np.asarray(out2), np.asarray(ref2),
                               rtol=2e-2, atol=2e-2)

    # Segformer module-level nn.Upsample(scale_factor=4, align_corners=True).
    out4 = jax.block_until_ready(
        fuse2d_forward(x, w1, gamma, beta, rmean, rvar, w2, b2, scale=4))
    assert out4.shape == (N, Cout, 4 * H, 4 * W), out4.shape
    ref4 = fuse2d_reference(x, w1, gamma, beta, rmean, rvar, w2, b2, scale=4)
    np.testing.assert_allclose(np.asarray(out4), np.asarray(ref4),
                               rtol=2e-2, atol=2e-2)

    print("KERNEL_OK")
</pallas_src>

<mosaic_0001>
module attributes {stable_mosaic.version = 11 : i64} {
  func.func @fuse_conv_kernel(%arg0: i32, %arg1: i32, %arg2: memref<1x8x256xbf16, #tpu.memory_space<vmem>>, %arg3: memref<4x8xbf16, #tpu.memory_space<vmem>>, %arg4: memref<4x1xf32, #tpu.memory_space<vmem>>, %arg5: memref<8x4xbf16, #tpu.memory_space<vmem>>, %arg6: memref<8x1xf32, #tpu.memory_space<vmem>>, %arg7: memref<1x8x256xbf16, #tpu.memory_space<vmem>>) attributes {dimension_semantics = [#tpu.dimension_semantics<parallel>, #tpu.dimension_semantics<parallel>], iteration_bounds = array<i64: 2, 1>, scalar_prefetch = 0 : i64, scratch_operands = 0 : i64, tpu.core_type = #tpu.core_type<tc>, window_params = [{transform_indices = @transform_0, window_bounds = array<i64: 1, 8, 256>}, {pipeline_mode = #tpu.pipeline_mode<synchronous>, transform_indices = @transform_1, window_bounds = array<i64: 4, 8>}, {pipeline_mode = #tpu.pipeline_mode<synchronous>, transform_indices = @transform_2, window_bounds = array<i64: 4, 1>}, {pipeline_mode = #tpu.pipeline_mode<synchronous>, transform_indices = @transform_3, window_bounds = array<i64: 8, 4>}, {pipeline_mode = #tpu.pipeline_mode<synchronous>, transform_indices = @transform_4, window_bounds = array<i64: 8, 1>}, {transform_indices = @transform_5, window_bounds = array<i64: 1, 8, 256>}]} {
    %c0 = arith.constant 0 : index
    %c0_0 = arith.constant 0 : index
    %c0_1 = arith.constant 0 : index
    %0 = vector.load %arg2[%c0, %c0_0, %c0_1] : memref<1x8x256xbf16, #tpu.memory_space<vmem>>, vector<1x8x256xbf16>
    %1 = vector.shape_cast %0 : vector<1x8x256xbf16> to vector<8x256xbf16>
    %c0_2 = arith.constant 0 : index
    %c0_3 = arith.constant 0 : index
    %2 = vector.load %arg3[%c0_2, %c0_3] : memref<4x8xbf16, #tpu.memory_space<vmem>>, vector<4x8xbf16>
    %cst = arith.constant dense<0.000000e+00> : vector<4x256xf32>
    %3 = tpu.matmul %2, %1, %cst {dimension_numbers = #tpu.dot_dimension_numbers<[1], [0], [0], [1], [0, 0, 1, 1], [], []>} : vector<4x8xbf16>, vector<8x256xbf16>, vector<4x256xf32> -> vector<4x256xf32>
    %c0_4 = arith.constant 0 : index
    %c0_5 = arith.constant 0 : index
    %4 = vector.load %arg4[%c0_4, %c0_5] : memref<4x1xf32, #tpu.memory_space<vmem>>, vector<4x1xf32>
    %5 = vector.broadcast %4 : vector<4x1xf32> to vector<4x256xf32>
    %6 = arith.addf %3, %5 : vector<4x256xf32>
    %cst_6 = arith.constant 0.000000e+00 : f32
    %7 = vector.broadcast %cst_6 : f32 to vector<4x256xf32>
    %8 = arith.maximumf %6, %7 : vector<4x256xf32>
    %c0_7 = arith.constant 0 : index
    %c0_8 = arith.constant 0 : index
    %9 = vector.load %arg5[%c0_7, %c0_8] : memref<8x4xbf16, #tpu.memory_space<vmem>>, vector<8x4xbf16>
    %10 = arith.truncf %8 : vector<4x256xf32> to vector<4x256xbf16>
    %cst_9 = arith.constant dense<0.000000e+00> : vector<8x256xf32>
    %11 = tpu.matmul %9, %10, %cst_9 {dimension_numbers = #tpu.dot_dimension_numbers<[1], [0], [0], [1], [0, 0, 1, 1], [], []>} : vector<8x4xbf16>, vector<4x256xbf16>, vector<8x256xf32> -> vector<8x256xf32>
    %c0_10 = arith.constant 0 : index
    %c0_11 = arith.constant 0 : index
    %12 = vector.load %arg6[%c0_10, %c0_11] : memref<8x1xf32, #tpu.memory_space<vmem>>, vector<8x1xf32>
    %13 = vector.broadcast %12 : vector<8x1xf32> to vector<8x256xf32>
    %14 = arith.addf %11, %13 : vector<8x256xf32>
    %15 = arith.truncf %14 : vector<8x256xf32> to vector<8x256xbf16>
    %c0_12 = arith.constant 0 : index
    %c0_13 = arith.constant 0 : index
    %c0_14 = arith.constant 0 : index
    %16 = vector.load %arg7[%c0_12, %c0_13, %c0_14] : memref<1x8x256xbf16, #tpu.memory_space<vmem>>, vector<1x8x256xbf16>
    %17 = vector.shape_cast %16 : vector<1x8x256xbf16> to vector<8x256xbf16>
    %18 = vector.shape_cast %15 : vector<8x256xbf16> to vector<1x8x256xbf16>
    tpu.vector_store %arg7[%c0_12, %c0_13, %c0_14], %18 {strides = array<i32>} : memref<1x8x256xbf16, #tpu.memory_space<vmem>>, vector<1x8x256xbf16>,
    return
  }
  func.func @transform_0(%arg0: i32, %arg1: i32) -> (i32, i32, i32) {
    %c0_i32 = arith.constant 0 : i32
    %c0_i32_0 = arith.constant 0 : i32
    return %arg0, %c0_i32, %arg1 : i32, i32, i32
  }
  func.func @transform_1(%arg0: i32, %arg1: i32) -> (i32, i32) {
    %c0_i32 = arith.constant 0 : i32
    %c0_i32_0 = arith.constant 0 : i32
    %c0_i32_1 = arith.constant 0 : i32
    return %c0_i32, %c0_i32_0 : i32, i32
  }
  func.func @transform_2(%arg0: i32, %arg1: i32) -> (i32, i32) {
    %c0_i32 = arith.constant 0 : i32
    %c0_i32_0 = arith.constant 0 : i32
    %c0_i32_1 = arith.constant 0 : i32
    return %c0_i32, %c0_i32_0 : i32, i32
  }
  func.func @transform_3(%arg0: i32, %arg1: i32) -> (i32, i32) {
    %c0_i32 = arith.constant 0 : i32
    %c0_i32_0 = arith.constant 0 : i32
    %c0_i32_1 = arith.constant 0 : i32
    return %c0_i32, %c0_i32_0 : i32, i32
  }
  func.func @transform_4(%arg0: i32, %arg1: i32) -> (i32, i32) {
    %c0_i32 = arith.constant 0 : i32
    %c0_i32_0 = arith.constant 0 : i32
    %c0_i32_1 = arith.constant 0 : i32
    return %c0_i32, %c0_i32_0 : i32, i32
  }
  func.func @transform_5(%arg0: i32, %arg1: i32) -> (i32, i32, i32) {
    %c0_i32 = arith.constant 0 : i32
    %c0_i32_0 = arith.constant 0 : i32
    return %arg0, %c0_i32, %arg1 : i32, i32, i32
  }
}

</mosaic_0001>

<bundles_post_ra>
// kernel: tpu_custom_call.1
= control target key start
LH: loop header
LB: loop body
LE: loop exit
PB: predicated region body
PF: predicated region fallthrough
CT: control target
= control target key end

     0   :  { %10 = vsyncpa [#allocation3], 0  ;;  %s746_s0 = inlined_call_operand.vmem [shape: bf16[2,8,256], index: 0, kind: input, shape index: {}]   ;;  %s747_s1 = inlined_call_operand.vmem [shape: bf16[4,8], index: 1, kind: input, shape index: {}]   ;;  %s748_s2 = inlined_call_operand.vmem [shape: f32[4,1], index: 2, kind: input, shape index: {}]   ;;  %s749_s3 = inlined_call_operand.vmem [shape: bf16[8,4], index: 3, kind: input, shape index: {}]   ;;  %s750_s4 = inlined_call_operand.vmem [shape: f32[8,1], index: 4, kind: input, shape index: {}]   ;;  %s751_s5 = inlined_call_operand.hbm [shape: bf16[2,8,256], index: 5, kind: output, shape index: {}]  }
   0x1   :  { %12 = vsyncpa [#allocation3 + $0x1], 0  ;;  %s637_s18 = smov 0   ;;  %s639_s19 = smov 0  }
   0x2   :  { %s641_s20 = smov 0   ;;  %s643_s21 = smov 0  }
   0x3   :  { %s645_s22 = smov 0   ;;  %s647_s23 = smov 0  }
   0x4 LB: > { %s450_s24 = sadd.s32 4294967295, %s604_s23   ;;  %s451_s25 = sadd.s32 4294967294, %s604_s23   ;;  %s604_s23 = sphi %s647_s23, %s18_s23   ;;  %s600_s22 = sphi %s645_s22, %s758_s22   ;;  %s596_s21 = sphi %s643_s21, %s757_s21   ;;  %s592_s20 = sphi %s641_s20, %s756_s20   ;;  %s588_s19 = sphi %s639_s19, %s755_s19   ;;  %s584_s18 = sphi %s637_s18, %s754_s18  }
   0x5   : > { %s30_s26 = sadd.s32 1, %s600_s22  ;;  %s151_s27 = sadd.s32 1, %s592_s20 }
   0x6   : > { %p32_p0 = scmp.ge.s32.totalorder %s30_s26, 2  ;;  %p161_p1 = scmp.ne.s32.totalorder %s592_s20, %s588_s19 }
   0x7   : > { %p162_p2 = scmp.eq.s32.totalorder %s450_s24, 1  ;;  %p167_p3 = scmp.ne.s32.totalorder %s588_s19, %s584_s18 }
   0x8   : > { %s760_s26 = smov (%p32_p0, %s30_s26), 0  ;;  %p168_p5 = scmp.eq.s32.totalorder %s451_s25, 1 }
   0x9   : > { %p677_p4 = por %p162_p2, %p161_p1  ;;  %s146_s29 = ssub.s32 %s600_s22, %s760_s26 }
   0xa   : > { %p454_p6 = scmp.ge.s32.totalorder %s604_s23, 1  ;;  %p149_p7 = scmp.eq.s32.totalorder %s146_s29, 0 }
   0xb   : > { %p684_p8 = por %p168_p5, %p167_p3  ;;  %p211_p9 = scmp.lt.s32.totalorder %s604_s23, 3 }
   0xc   : > { %s690_s6 = scalar_select %p149_p7, %s592_s20, %s151_s27  }
   0xd   : > { %p212_p10 = pnand %p454_p6, %p211_p9 }
   0xe   : > { %p244_p11 = scmp.lt.s32.totalorder (!%p212_p10), %s596_s21, 1  ;;  %s240_s27 = sand.u32 (!%p212_p10), 1, %s588_s19  }
   0xf   : > { %215 = sbr.rel (%p212_p10) target bundleno = 310 (0x136), region = 40  ;;  %s455_s29 = sshll.u32 (!%p212_p10), %s240_s27, 3 }
  0x10   : > { %s468_s7 = sshll.u32 (!%p212_p10), %s596_s21, 3  ;;  %s242_s11 = scalar_lea.vmem (!%p212_p10), [#allocation2], %s455_s29 }
  0x11   : > { %s371_s12 = sshll.u32 (!%p212_p10), %s242_s11, 4  ;;  %s356_s14 = scalar_lea.sflag (!%p212_p10), [#allocation3], %s240_s27  ;;  %s372_s12 = int_to_ptr.vmem [resolvable:$true] %s371_s12 }
  0x12   : > { %s546_s24 = scalar_lea.hbm (!%p212_p10), %s751_s5, 16 }
  0x14   : > { %v606_v0 = vmov 0   ;;  %v257_v1 = vld [vmem:[%s748_s2] sm:$0xf]  ;;  %s245_s9 = scalar_select %p244_p11, %s596_s21, 1  ;;  %vm272_vm0 = vcmask 1043456   ;;  %vm268_vm1 = vcmask 64512  }
  0x15   : > { %525 = vset.pattern.permute.xlu0 %v606_v0  ;;  %v310_v5 = vld [vmem:[%s750_s4] sm:$0xff]  ;;  %vm320_vm2 = vcmask 1041408   ;;  %vm316_vm3 = vcmask 31744  }
  0x16   : > { %260 = vperm.xlu0 %525, %v257_v1   ;;  %s467_s10 = sshll.u32 %s245_s9, 3  ;;  %v256_v10 = vld [vmem:[%s747_s1] sm:$0x3] }
  0x17   : > { %s251_s13 = scalar_lea.vmem %s746_s0, %s467_s10  ;;  %v307_v24 = vld [vmem:[%s749_s3] sm:$0xf]  ;;  %s369_s10 = scalar_lea.hbm %s751_s5, %s468_s7 }
  0x18   : > { %v255_v2 = vld [vmem:[%s251_s13] sm:$0xff]  ;;  %s373_s13 = sshll.u32 %s369_s10, 4  ;;  %s374_s13 = int_to_ptr.hbm [resolvable:$true] %s373_s13 }
  0x19   : > { %v264_v3 = vunpack.c.l.b16 %v255_v2  ;;  %v265_v4 = vunpack.c.h.b16 %v255_v2  ;;  %s540_s15 = sshra.s32 %s374_s13, 4  ;;  %s541_s15 = int_to_ptr.hbm [resolvable:$true] %s540_s15 }
  0x1a   : > { %s542_s21 = scalar_lea.hbm %s541_s15, 8  ;;  %p547_p1 = scmp.lt.s32.totalorder %s541_s15, %s751_s5 }
  0x1b   : > { %v266_v6 = vpack.c.b16 %v264_v3, %v264_v3  ;;  %v267_v7 = vpack.c.b16 %v265_v4, %v265_v4  ;;  %p543_p12 = scmp.ne.s32.totalorder %s541_s15, %s542_s21  ;;  %p548_p2 = scmp.lt.s32.totalorder %s546_s24, %s542_s21 }
  0x1d   : > { %v274_v8 = vsel %vm272_vm0, %v266_v6, 0  ;;  %v277_v9 = vsel %vm272_vm0, %v267_v7, 0  ;;  %p544_p13 = pnand %p543_p12, %p677_p4  ;;  %p549_p3 = por %p548_p2, %p547_p1 }
  0x1e   : > { %313 = vperm.xlu0 %525, %v310_v5   ;;  %286 = vmatpush.bf16.msra.mxu0 %v274_v8 }
  0x1f   : > { %299 = vmatpush.bf16.msra.mxu1 %v277_v9  ;;  %p545_p0 = pneg %p544_p13 }
  0x21   : > { %458 = vmatmul.msk.bf16.vlgmr.msra.gmra.mxu0 %vm268_vm1, %v256_v10  ;;  %p550_p5 = pnand %p549_p3, %p545_p0 }
  0x22   : > { %459 = vmatmul.msk.bf16.vlgmr.msra.gmra.mxu1 %vm268_vm1, %v256_v10 }
  0x88   : > { %v261_v11 = vpop.permute.xlu0 %260 }
  0x90   : > { %v314_v25 = vpop.permute.xlu0 %313 }
  0x9e   : > { %v288_v12 = vpop.f32.mrf.mxu0 }
  0x9f   : > { %v301_v13 = vpop.f32.mrf.mxu1  ;;  %v289_v14 = vadd.f32 %v288_v12, %v261_v11 }
  0xa0   : > { %v302_v15 = vadd.f32 %v301_v13, %v261_v11 }
  0xa1   : > { %v305_v16 = vmax.f32 %v289_v14, 0.0 }
  0xa2   : > { %v306_v17 = vmax.f32 %v302_v15, 0.0 }
  0xa3   : > { %v308_v18 = vpack.c.bf16 %v305_v16, %v305_v16 }
  0xa4   : > { %v309_v19 = vpack.c.bf16 %v306_v17, %v306_v17 }
  0xa5   : > { %v322_v20 = vsel %vm320_vm2, %v308_v18, 0 }
  0xa6   : > { %v325_v21 = vsel %vm320_vm2, %v309_v19, 0  ;;  %v290_v22 = vpop.f32.mrf.mxu0  ;;  %334 = vmatpush.bf16.msra.mxu2 %v322_v20 }
  0xa7   : > { %v303_v23 = vpop.f32.mrf.mxu1  ;;  %347 = vmatpush.bf16.msra.mxu3 %v325_v21 }
  0xa9   : > { %460 = vmatmul.msk.bf16.vlgmr.msra.gmra.mxu2 %vm316_vm3, %v307_v24 }
  0xaa   : > { %461 = vmatmul.msk.bf16.vlgmr.msra.gmra.mxu3 %vm316_vm3, %v307_v24 }
 0x12c   : > { %v336_v26 = vpop.f32.mrf.mxu2 }
 0x12d   : > { %v349_v27 = vpop.f32.mrf.mxu3  ;;  %v337_v28 = vadd.f32 %v336_v26, %v314_v25 }
 0x12e   : > { %v350_v29 = vadd.f32 %v349_v27, %v314_v25 }
 0x130   : > { %v353_v30 = vpack.c.bf16 %v350_v29, %v337_v28 }
 0x132   : > { %354 = vst [vmem:[%s242_s11] sm:$0xff] %v353_v30 }
 0x133   : > { %553 = shalt.err (!%p550_p5)
}
 0x134   : > { %469 = dma.vmem_to_hbm [thread:$0]  (%p677_p4), %s372_s12, 128, %s374_s13, %s356_s14   ;;  %v338_v31 = vpop.f32.mrf.mxu2 }
 0x135   : > { %v351_v32 = vpop.f32.mrf.mxu3 }
 0x136 PF: > { %p475_p6 = scmp.ge.s32.totalorder %s604_s23, 2  ;;  %s385_s27 = sand.u32 1, %s584_s18  }
 0x137   : > { %s386_s7 = scalar_lea.sflag [#allocation3], %s385_s27 }
 0x138   : > { %p472_p7 = pnand %p475_p6, %p684_p8 }
 0x13a   : > { %p473_p9 = pneg %p472_p7 }
 0x13c   : > { %579 = dma.done.wait (%p473_p9), %s386_s7, 128  }
 0x13d   : > { %581 = vsyncadd (%p473_p9), %s386_s7, 4294967168  ;;  %s18_s23 = sadd.s32 1, %s604_s23   ;;  %s754_s18 = smov %s588_s19 }
 0x13e   : > { %p15_p10 = scmp.ge.s32.totalorder %s18_s23, 4   ;;  %s755_s19 = smov %s592_s20 }
 0x13f   : > { %s756_s20 = smov %s690_s6  ;;  %s757_s21 = smov %s600_s22 }
 0x140   : > { %s758_s22 = smov %s760_s26  ;;  %17 = sbr.rel (!%p15_p10) target bundleno = 4 (0x4), region = 75 }
 0x145   :  { %392 = vsyncpa [#allocation3], 1 }
 0x146   :  { %394 = vsyncpa [#allocation3 + $0x1], 1 }

</bundles_post_ra>
